<compile_context>
chip_gen: v7x
topology: tpu7x:2x2x1
jax: 0.10.0
libtpu: 0.0.40
codegen_flags: <defaults>
</compile_context>

<pallas_src>
import jax
import jax.numpy as jnp
from jax.experimental import pallas as pl
from jax.experimental.pallas import tpu as pltpu

_LANES = 128          # vreg lane width
_MAX_TILE_B = 256     # conservative: fits easily in v5e's 16 MiB scoped VMEM


def _round_up(x, m):
    return ((x + m - 1) // m) * m


def _critic_kernel(s_ref, a_ref,
                   w1s_ref, w1a_ref, b1_ref,
                   w2_ref, b2_ref,
                   w3_ref, b3_ref,
                   o_ref):
    # x = cat([state, action], 1).float()  -- fused into the split first matmul.
    s = s_ref[...].astype(jnp.float32)
    a = a_ref[...].astype(jnp.float32)

    # linear1 + relu  (padded hidden columns stay exactly 0 through the relu)
    h1 = (jnp.dot(s, w1s_ref[...], preferred_element_type=jnp.float32)
          + jnp.dot(a, w1a_ref[...], preferred_element_type=jnp.float32)
          + b1_ref[...])
    h1 = jnp.maximum(h1, 0.0)

    # linear2 + relu
    h2 = jnp.dot(h1, w2_ref[...], preferred_element_type=jnp.float32) + b2_ref[...]
    h2 = jnp.maximum(h2, 0.0)

    # linear3: N=1 output -> VPU multiply + XLU lane reduction (MXU would waste
    # 127/128 output lanes).  Broadcast across all 128 lanes via the (1, 128)
    # bias so the store is lane-dense; wrapper slices column 0.
    q = jnp.sum(h2 * w3_ref[...], axis=-1, keepdims=True)   # (tile_b, 1)
    o_ref[...] = q + b3_ref[...]                             # (tile_b, 128)


def prepare_critic_params(params, states_dim):
    """One-time layout prep: weights as [in, out_padded] f32, biases as (1, out_padded).

    Doing this once at init (not per forward call) removes the repeated XLA
    transpose/reshape/pad ops from the training-step hot path.
    """
    w1, b1, w2, b2, w3, b3 = (params["w1"], params["b1"], params["w2"],
                              params["b2"], params["w3"], params["b3"])
    S = states_dim
    H = w1.shape[0]          # hidden_dim
    H1 = w2.shape[0]         # hidden_dim1
    A = w1.shape[1] - S
    Hp = _round_up(H, _LANES)
    H1p = _round_up(H1, _LANES)

    w1_t = jnp.asarray(w1, jnp.float32).T                      # (S+A, H)
    w1s = jnp.zeros((S, Hp), jnp.float32).at[:, :H].set(w1_t[:S, :])
    w1a = jnp.zeros((A, Hp), jnp.float32).at[:, :H].set(w1_t[S:, :])
    b1p = jnp.zeros((1, Hp), jnp.float32).at[0, :H].set(jnp.asarray(b1, jnp.float32))

    w2_t = jnp.asarray(w2, jnp.float32).T                      # (H, H1)
    w2p = jnp.zeros((Hp, H1p), jnp.float32).at[:H, :H1].set(w2_t)
    b2p = jnp.zeros((1, H1p), jnp.float32).at[0, :H1].set(jnp.asarray(b2, jnp.float32))

    w3row = jnp.zeros((1, H1p), jnp.float32).at[0, :H1].set(jnp.asarray(w3, jnp.float32)[0, :])
    b3row = jnp.full((1, _LANES), b3[0], dtype=jnp.float32)

    return {"w1s": w1s, "w1a": w1a, "b1": b1p,
            "w2": w2p, "b2": b2p, "w3": w3row, "b3": b3row}


def critic_forward(state, action, prep):
    """Pallas-backed Critic.forward.  state: (B, S), action: (B, A) -> (B, 1)."""
    B, S = state.shape
    A = action.shape[1]
    Hp = prep["w1s"].shape[1]
    H1p = prep["w2"].shape[1]

    # Batch tile: full batch for small B, otherwise a fixed (8-aligned) tile so
    # activation DMA is pipelined and VMEM use is bounded on all generations.
    tile_b = B if B <= _MAX_TILE_B else _MAX_TILE_B
    grid = (pl.cdiv(B, tile_b),)

    const = lambda i: (0, 0)   # weights/biases resident in VMEM across the grid

    out = pl.pallas_call(
        _critic_kernel,
        out_shape=jax.ShapeDtypeStruct((B, _LANES), jnp.float32),
        grid=grid,
        in_specs=[
            pl.BlockSpec((tile_b, S), lambda i: (i, 0)),     # state
            pl.BlockSpec((tile_b, A), lambda i: (i, 0)),     # action
            pl.BlockSpec((S, Hp), const),                    # w1[:, :S]^T  (padded)
            pl.BlockSpec((A, Hp), const),                    # w1[:, S:]^T  (padded)
            pl.BlockSpec((1, Hp), const),                    # b1
            pl.BlockSpec((Hp, H1p), const),                  # w2^T (padded)
            pl.BlockSpec((1, H1p), const),                   # b2
            pl.BlockSpec((1, H1p), const),                   # w3 row (padded)
            pl.BlockSpec((1, _LANES), const),                # b3 (lane-broadcast)
        ],
        out_specs=pl.BlockSpec((tile_b, _LANES), lambda i: (i, 0)),
        compiler_params=pltpu.CompilerParams(
            dimension_semantics=("parallel",)),
    )(state, action, prep["w1s"], prep["w1a"], prep["b1"],
      prep["w2"], prep["b2"], prep["w3"], prep["b3"])

    return out[:, :1]


def init_critic_params(key, states_dim, actions_dim, hidden_dim, hidden_dim1,
                       init_w=0.003):
    """Deterministic init mimicking nn.Linear defaults + uniform(-init_w, init_w) for layer 3."""
    ks = jax.random.split(key, 6)

    def lin_init(kw, kb, fan_in, fan_out):
        bound = 1.0 / jnp.sqrt(jnp.float32(fan_in))
        w = jax.random.uniform(kw, (fan_out, fan_in), jnp.float32, -bound, bound)
        b = jax.random.uniform(kb, (fan_out,), jnp.float32, -bound, bound)
        return w, b

    w1, b1 = lin_init(ks[0], ks[1], states_dim + actions_dim, hidden_dim)
    w2, b2 = lin_init(ks[2], ks[3], hidden_dim, hidden_dim1)
    w3 = jax.random.uniform(ks[4], (1, hidden_dim1), jnp.float32, -init_w, init_w)
    b3 = jax.random.uniform(ks[5], (1,), jnp.float32, -init_w, init_w)
    return {"w1": w1, "b1": b1, "w2": w2, "b2": b2, "w3": w3, "b3": b3}


def critic_reference(state, action, p):
    x = jnp.concatenate([state, action], axis=1).astype(jnp.float32)
    h1 = jax.nn.relu(x @ p["w1"].T + p["b1"])
    h2 = jax.nn.relu(h1 @ p["w2"].T + p["b2"])
    return h2 @ p["w3"].T + p["b3"]


if __name__ == "__main__":
    B, STATES, ACTIONS, HIDDEN, HIDDEN1 = 8, 16, 8, 32, 32

    key = jax.random.PRNGKey(0)
    k_s, k_a, k_p = jax.random.split(key, 3)
    state = jax.random.normal(k_s, (B, STATES), jnp.float32)
    action = jax.random.normal(k_a, (B, ACTIONS), jnp.float32)

    params = init_critic_params(k_p, STATES, ACTIONS, HIDDEN, HIDDEN1)
    prep = prepare_critic_params(params, STATES)   # one-time layout/padding

    q = critic_forward(state, action, prep)
    q = jax.block_until_ready(q)

    q_ref = critic_reference(state, action, params)
    assert q.shape == (B, 1), q.shape
    assert jnp.allclose(q, q_ref, atol=1e-5, rtol=1e-5), "mismatch vs. reference"

    print("KERNEL_OK")
</pallas_src>

<mosaic_0001>
module attributes {stable_mosaic.version = 11 : i64} {
  func.func @_critic_kernel(%arg0: i32, %arg1: memref<8x16xf32, #tpu.memory_space<vmem>>, %arg2: memref<8x8xf32, #tpu.memory_space<vmem>>, %arg3: memref<16x128xf32, #tpu.memory_space<vmem>>, %arg4: memref<8x128xf32, #tpu.memory_space<vmem>>, %arg5: memref<1x128xf32, #tpu.memory_space<vmem>>, %arg6: memref<128x128xf32, #tpu.memory_space<vmem>>, %arg7: memref<1x128xf32, #tpu.memory_space<vmem>>, %arg8: memref<1x128xf32, #tpu.memory_space<vmem>>, %arg9: memref<1x128xf32, #tpu.memory_space<vmem>>, %arg10: memref<8x128xf32, #tpu.memory_space<vmem>>) attributes {dimension_semantics = [#tpu.dimension_semantics<parallel>], iteration_bounds = array<i64: 1>, scalar_prefetch = 0 : i64, scratch_operands = 0 : i64, tpu.core_type = #tpu.core_type<tc>, window_params = [{transform_indices = @transform_0, window_bounds = array<i64: 8, 16>}, {transform_indices = @transform_1, window_bounds = array<i64: 8, 8>}, {pipeline_mode = #tpu.pipeline_mode<synchronous>, transform_indices = @transform_2, window_bounds = array<i64: 16, 128>}, {pipeline_mode = #tpu.pipeline_mode<synchronous>, transform_indices = @transform_3, window_bounds = array<i64: 8, 128>}, {pipeline_mode = #tpu.pipeline_mode<synchronous>, transform_indices = @transform_4, window_bounds = array<i64: 1, 128>}, {pipeline_mode = #tpu.pipeline_mode<synchronous>, transform_indices = @transform_5, window_bounds = array<i64: 128, 128>}, {pipeline_mode = #tpu.pipeline_mode<synchronous>, transform_indices = @transform_6, window_bounds = array<i64: 1, 128>}, {pipeline_mode = #tpu.pipeline_mode<synchronous>, transform_indices = @transform_7, window_bounds = array<i64: 1, 128>}, {pipeline_mode = #tpu.pipeline_mode<synchronous>, transform_indices = @transform_8, window_bounds = array<i64: 1, 128>}, {transform_indices = @transform_9, window_bounds = array<i64: 8, 128>}]} {
    %c0 = arith.constant 0 : index
    %c0_0 = arith.constant 0 : index
    %0 = vector.load %arg1[%c0, %c0_0] : memref<8x16xf32, #tpu.memory_space<vmem>>, vector<8x16xf32>
    %c0_1 = arith.constant 0 : index
    %c0_2 = arith.constant 0 : index
    %1 = vector.load %arg2[%c0_1, %c0_2] : memref<8x8xf32, #tpu.memory_space<vmem>>, vector<8x8xf32>
    %c0_3 = arith.constant 0 : index
    %c0_4 = arith.constant 0 : index
    %2 = vector.load %arg3[%c0_3, %c0_4] : memref<16x128xf32, #tpu.memory_space<vmem>>, vector<16x128xf32>
    %cst = arith.constant dense<0.000000e+00> : vector<8x128xf32>
    %3 = tpu.matmul %0, %2, %cst {dimension_numbers = #tpu.dot_dimension_numbers<[1], [0], [0], [1], [0, 0, 1, 1], [], []>} : vector<8x16xf32>, vector<16x128xf32>, vector<8x128xf32> -> vector<8x128xf32>
    %c0_5 = arith.constant 0 : index
    %c0_6 = arith.constant 0 : index
    %4 = vector.load %arg4[%c0_5, %c0_6] : memref<8x128xf32, #tpu.memory_space<vmem>>, vector<8x128xf32>
    %cst_7 = arith.constant dense<0.000000e+00> : vector<8x128xf32>
    %5 = tpu.matmul %1, %4, %cst_7 {dimension_numbers = #tpu.dot_dimension_numbers<[1], [0], [0], [1], [0, 0, 1, 1], [], []>} : vector<8x8xf32>, vector<8x128xf32>, vector<8x128xf32> -> vector<8x128xf32>
    %6 = arith.addf %3, %5 : vector<8x128xf32>
    %c0_8 = arith.constant 0 : index
    %c0_9 = arith.constant 0 : index
    %7 = vector.load %arg5[%c0_8, %c0_9] : memref<1x128xf32, #tpu.memory_space<vmem>>, vector<1x128xf32>
    %8 = vector.broadcast %7 : vector<1x128xf32> to vector<8x128xf32>
    %9 = arith.addf %6, %8 : vector<8x128xf32>
    %cst_10 = arith.constant 0.000000e+00 : f32
    %10 = vector.broadcast %cst_10 : f32 to vector<8x128xf32>
    %11 = arith.maximumf %9, %10 : vector<8x128xf32>
    %c0_11 = arith.constant 0 : index
    %c0_12 = arith.constant 0 : index
    %12 = vector.load %arg6[%c0_11, %c0_12] : memref<128x128xf32, #tpu.memory_space<vmem>>, vector<128x128xf32>
    %cst_13 = arith.constant dense<0.000000e+00> : vector<8x128xf32>
    %13 = tpu.matmul %11, %12, %cst_13 {dimension_numbers = #tpu.dot_dimension_numbers<[1], [0], [0], [1], [0, 0, 1, 1], [], []>} : vector<8x128xf32>, vector<128x128xf32>, vector<8x128xf32> -> vector<8x128xf32>
    %c0_14 = arith.constant 0 : index
    %c0_15 = arith.constant 0 : index
    %14 = vector.load %arg7[%c0_14, %c0_15] : memref<1x128xf32, #tpu.memory_space<vmem>>, vector<1x128xf32>
    %15 = vector.broadcast %14 : vector<1x128xf32> to vector<8x128xf32>
    %16 = arith.addf %13, %15 : vector<8x128xf32>
    %cst_16 = arith.constant 0.000000e+00 : f32
    %17 = vector.broadcast %cst_16 : f32 to vector<8x128xf32>
    %18 = arith.maximumf %16, %17 : vector<8x128xf32>
    %c0_17 = arith.constant 0 : index
    %c0_18 = arith.constant 0 : index
    %19 = vector.load %arg8[%c0_17, %c0_18] : memref<1x128xf32, #tpu.memory_space<vmem>>, vector<1x128xf32>
    %20 = vector.broadcast %19 : vector<1x128xf32> to vector<8x128xf32>
    %21 = arith.mulf %18, %20 : vector<8x128xf32>
    %cst_19 = arith.constant dense<0.000000e+00> : vector<8xf32>
    %22 = vector.multi_reduction <add>, %21, %cst_19 [1] : vector<8x128xf32> to vector<8xf32>
    %23 = vector.shape_cast %22 : vector<8xf32> to vector<8x1xf32>
    %c0_20 = arith.constant 0 : index
    %c0_21 = arith.constant 0 : index
    %24 = vector.load %arg9[%c0_20, %c0_21] : memref<1x128xf32, #tpu.memory_space<vmem>>, vector<1x128xf32>
    %25 = vector.broadcast %23 : vector<8x1xf32> to vector<8x128xf32>
    %26 = vector.broadcast %24 : vector<1x128xf32> to vector<8x128xf32>
    %27 = arith.addf %25, %26 : vector<8x128xf32>
    %c0_22 = arith.constant 0 : index
    %c0_23 = arith.constant 0 : index
    %28 = vector.load %arg10[%c0_22, %c0_23] : memref<8x128xf32, #tpu.memory_space<vmem>>, vector<8x128xf32>
    tpu.vector_store %arg10[%c0_22, %c0_23], %27 {strides = array<i32>} : memref<8x128xf32, #tpu.memory_space<vmem>>, vector<8x128xf32>,
    return
  }
  func.func @transform_0(%arg0: i32) -> (i32, i32) {
    %c0_i32 = arith.constant 0 : i32
    %c0_i32_0 = arith.constant 0 : i32
    return %arg0, %c0_i32 : i32, i32
  }
  func.func @transform_1(%arg0: i32) -> (i32, i32) {
    %c0_i32 = arith.constant 0 : i32
    %c0_i32_0 = arith.constant 0 : i32
    return %arg0, %c0_i32 : i32, i32
  }
  func.func @transform_2(%arg0: i32) -> (i32, i32) {
    %c0_i32 = arith.constant 0 : i32
    %c0_i32_0 = arith.constant 0 : i32
    %c0_i32_1 = arith.constant 0 : i32
    return %c0_i32, %c0_i32_0 : i32, i32
  }
  func.func @transform_3(%arg0: i32) -> (i32, i32) {
    %c0_i32 = arith.constant 0 : i32
    %c0_i32_0 = arith.constant 0 : i32
    %c0_i32_1 = arith.constant 0 : i32
    return %c0_i32, %c0_i32_0 : i32, i32
  }
  func.func @transform_4(%arg0: i32) -> (i32, i32) {
    %c0_i32 = arith.constant 0 : i32
    %c0_i32_0 = arith.constant 0 : i32
    %c0_i32_1 = arith.constant 0 : i32
    return %c0_i32, %c0_i32_0 : i32, i32
  }
  func.func @transform_5(%arg0: i32) -> (i32, i32) {
    %c0_i32 = arith.constant 0 : i32
    %c0_i32_0 = arith.constant 0 : i32
    %c0_i32_1 = arith.constant 0 : i32
    return %c0_i32, %c0_i32_0 : i32, i32
  }
  func.func @transform_6(%arg0: i32) -> (i32, i32) {
    %c0_i32 = arith.constant 0 : i32
    %c0_i32_0 = arith.constant 0 : i32
    %c0_i32_1 = arith.constant 0 : i32
    return %c0_i32, %c0_i32_0 : i32, i32
  }
  func.func @transform_7(%arg0: i32) -> (i32, i32) {
    %c0_i32 = arith.constant 0 : i32
    %c0_i32_0 = arith.constant 0 : i32
    %c0_i32_1 = arith.constant 0 : i32
    return %c0_i32, %c0_i32_0 : i32, i32
  }
  func.func @transform_8(%arg0: i32) -> (i32, i32) {
    %c0_i32 = arith.constant 0 : i32
    %c0_i32_0 = arith.constant 0 : i32
    %c0_i32_1 = arith.constant 0 : i32
    return %c0_i32, %c0_i32_0 : i32, i32
  }
  func.func @transform_9(%arg0: i32) -> (i32, i32) {
    %c0_i32 = arith.constant 0 : i32
    %c0_i32_0 = arith.constant 0 : i32
    return %arg0, %c0_i32 : i32, i32
  }
}

</mosaic_0001>

<bundles_post_ra>
// kernel: tpu_custom_call.1
= control target key start
LH: loop header
LB: loop body
LE: loop exit
PB: predicated region body
PF: predicated region fallthrough
CT: control target
= control target key end

     0   :  { %14 = vsyncpa [#allocation3], 0  ;;  %s744_s0 = inlined_call_operand.hbm [shape: f32[8,16], index: 0, kind: input, shape index: {}]   ;;  %s745_s1 = inlined_call_operand.hbm [shape: f32[8,8], index: 1, kind: input, shape index: {}]   ;;  %s746_s2 = inlined_call_operand.hbm [shape: f32[16,128], index: 2, kind: input, shape index: {}]   ;;  %s747_s3 = inlined_call_operand.vmem [shape: f32[8,128], index: 3, kind: input, shape index: {}]   ;;  %s748_s4 = inlined_call_operand.vmem [shape: f32[1,128], index: 4, kind: input, shape index: {}]   ;;  %s749_s5 = inlined_call_operand.hbm [shape: f32[128,128], index: 5, kind: input, shape index: {}]   ;;  %s750_s6 = inlined_call_operand.vmem [shape: f32[1,128], index: 6, kind: input, shape index: {}]   ;;  %s751_s7 = inlined_call_operand.vmem [shape: f32[1,128], index: 7, kind: input, shape index: {}]   ;;  %s752_s8 = inlined_call_operand.vmem [shape: f32[1,128], index: 8, kind: input, shape index: {}]   ;;  %s753_s9 = inlined_call_operand.hbm [shape: f32[8,128], index: 9, kind: output, shape index: {}]  }
   0x1   :  { %15 = vsyncpa [#allocation6], 0 }
   0x2   :  { %16 = vsyncpa [#allocation9], 0 }
   0x3   :  { %17 = vsyncpa [#allocation4], 0  ;;  %s606_s30 = smov [#allocation5]   ;;  %s607_s11 = smov [#allocation2]  }
   0x4   :  { %s34_s10 = sshll.u32 %s606_s30, 4  ;;  %s24_s12 = sshll.u32 %s607_s11, 4  ;;  %s35_s10 = int_to_ptr.vmem [resolvable:$true] %s34_s10  ;;  %s25_s12 = int_to_ptr.vmem [resolvable:$true] %s24_s12 }
   0x5   :  { %s488_s15 = scalar_lea.hbm %s745_s1, 128 }
   0x6   :  { %p489_p0 = scmp.ne.s32.totalorder %s745_s1, %s488_s15  ;;  %p492_p1 = scmp.lt.u32.totalorder %s488_s15, %s745_s1 }
   0x8   :  { %p494_p2 = pnand %p492_p1, %p489_p0 }
   0xa   :  { %497 = shalt.err (!%p494_p2)
}
   0xb   :  { %s498_s20 = scalar_lea.vmem %s35_s10, 128  ;;  %p503_p4 = scmp.lt.s32.totalorder %s35_s10, %s35_s10 }
   0xc   :  { %p499_p3 = scmp.ne.s32.totalorder %s35_s10, %s498_s20  ;;  %p504_p5 = scmp.lt.s32.totalorder %s498_s20, %s498_s20 }
   0xe   :  { %p505_p6 = por %p504_p5, %p503_p4 }
  0x10   :  { %p506_p7 = pnand %p505_p6, %p499_p3 }
  0x12   :  { %509 = shalt.err (!%p506_p7)
}
  0x13   :  { %37 = dma.hbm_to_vmem [thread:$0]  %s745_s1, 128, %s35_s10, [#allocation6]  }
  0x14   :  { %s510_s25 = scalar_lea.hbm %s744_s0, 128 }
  0x15   :  { %p511_p8 = scmp.ne.s32.totalorder %s744_s0, %s510_s25  ;;  %p514_p9 = scmp.lt.u32.totalorder %s510_s25, %s744_s0 }
  0x17   :  { %p516_p10 = pnand %p514_p9, %p511_p8 }
  0x19   :  { %519 = shalt.err (!%p516_p10)
}
  0x1a   :  { %s520_s30 = scalar_lea.vmem %s25_s12, 128  ;;  %p525_p12 = scmp.lt.s32.totalorder %s25_s12, %s25_s12 }
  0x1b   :  { %p521_p11 = scmp.ne.s32.totalorder %s25_s12, %s520_s30  ;;  %p526_p13 = scmp.lt.s32.totalorder %s520_s30, %s520_s30 }
  0x1d   :  { %p527_p0 = por %p526_p13, %p525_p12 }
  0x1f   :  { %p528_p1 = pnand %p527_p0, %p521_p11 }
  0x21   :  { %531 = shalt.err (!%p528_p1)
}
  0x22   :  { %27 = dma.hbm_to_vmem [thread:$0]  %s744_s0, 128, %s25_s12, [#allocation3]  }
  0x23   :  { %s608_s11 = smov [#allocation7]   ;;  %s532_s16 = scalar_lea.hbm %s746_s2, 256 }
  0x24   :  { %s43_s13 = sshll.u32 %s608_s11, 4  ;;  %p533_p2 = scmp.ne.s32.totalorder %s746_s2, %s532_s16  ;;  %s44_s13 = int_to_ptr.vmem [resolvable:$true] %s43_s13 }
  0x25   :  { %p536_p3 = scmp.lt.u32.totalorder %s532_s16, %s746_s2 }
  0x27   :  { %p538_p4 = pnand %p536_p3, %p533_p2 }
  0x29   :  { %541 = shalt.err (!%p538_p4)
}
  0x2a   :  { %s542_s21 = scalar_lea.vmem %s44_s13, 256  ;;  %p547_p6 = scmp.lt.s32.totalorder %s44_s13, %s44_s13 }
  0x2b   :  { %p543_p5 = scmp.ne.s32.totalorder %s44_s13, %s542_s21  ;;  %p548_p7 = scmp.lt.s32.totalorder %s542_s21, %s542_s21 }
  0x2d   :  { %p549_p8 = por %p548_p7, %p547_p6 }
  0x2f   :  { %p550_p9 = pnand %p549_p8, %p543_p5 }
  0x31   :  { %553 = shalt.err (!%p550_p9)
}
  0x32   :  { %s609_s0 = smov 128   ;;  %s610_s12 = smov 8  }
  0x33   :  { %49 = dma.hbm_to_vmem [thread:$0]  %s746_s2, 256, %s44_s13, [#allocation6], %s609_s0, %s609_s0, %s610_s12  }
  0x34   :  { %s611_s24 = smov [#allocation8]   ;;  %s554_s28 = scalar_lea.hbm %s749_s5, 2048 }
  0x35   :  { %s59_s25 = sshll.u32 %s611_s24, 4  ;;  %p555_p10 = scmp.ne.s32.totalorder %s749_s5, %s554_s28  ;;  %s60_s25 = int_to_ptr.vmem [resolvable:$true] %s59_s25 }
  0x36   :  { %p558_p11 = scmp.lt.u32.totalorder %s554_s28, %s749_s5 }
  0x38   :  { %p560_p12 = pnand %p558_p11, %p555_p10 }
  0x3a   :  { %563 = shalt.err (!%p560_p12)
}
  0x3b   :  { %s564_s11 = scalar_lea.vmem %s60_s25, 2048  ;;  %p569_p0 = scmp.lt.s32.totalorder %s60_s25, %s60_s25 }
  0x3c   :  { %p565_p13 = scmp.ne.s32.totalorder %s60_s25, %s564_s11  ;;  %p570_p1 = scmp.lt.s32.totalorder %s564_s11, %s564_s11 }
  0x3e   :  { %p571_p2 = por %p570_p1, %p569_p0 }
  0x40   :  { %p572_p3 = pnand %p571_p2, %p565_p13 }
  0x42   :  { %575 = shalt.err (!%p572_p3)
}
  0x43   :  { %65 = dma.hbm_to_vmem [thread:$0]  %s749_s5, 2048, %s60_s25, [#allocation9], %s609_s0, %s609_s0, %s610_s12  }
  0x44   :  { %598 = dma.done.wait [#allocation3], 128  }
  0x45   :  { %599 = vsyncadd [#allocation3], 4294967168 }
  0x46   :  { %600 = dma.done.wait [#allocation6], 384  }
  0x47   :  { %601 = vsyncadd [#allocation6], 4294966912 }
  0x48   :  { %602 = dma.done.wait [#allocation9], 2048  }
  0x49   :  { %603 = vsyncadd [#allocation9], 4294965248  ;;  %v612_v0 = vmov 0.0   ;;  %vm613_vm0 = vmmov 0   ;;  %v614_v1 = vmov 0.0|0.0   ;;  %vm89_vm1 = vcmask 64512  }
  0x4a   :  { %404 = vmatprep.subr.mxu1 %v612_v0  ;;  %406 = vmatprep.mubr.msk.f32.mxu1 %vm613_vm0, %v612_v0  ;;  %v88_v2 = vld [vmem:[%s747_s3] sm:$0xff]  ;;  %v85_v3 = vld [vmem:[#allocation5] sm:$0xff]  ;;  %v86_v4 = vld [vmem:[#allocation7] sm:$0xff]  ;;  %vm163_vm2 = vcmask 130048   ;;  %s615_s21 = smov [#allocation10]  }
  0x4b   :  { %454 = vmatprep.subr.bf16.mxu0 %v614_v1  ;;  %448 = vmatprep.mubr.msk.f32.mxu0 %vm613_vm0, %v612_v0  ;;  %v87_v5 = vld [vmem:[#allocation7 + $0x8] sm:$0xff]  ;;  %v246_v6 = vld [vmem:[#allocation8] sm:$0xff]  ;;  %v247_v8 = vld [vmem:[#allocation8 + $0x8] sm:$0xff]  ;;  %s365_s0 = sshll.u32 %s615_s21, 4  ;;  %s366_s0 = int_to_ptr.vmem [resolvable:$true] %s365_s0 }
  0x4c   :  { %405 = vmatpush3.msra.mxu1 %v88_v2  ;;  %v452_v7 = vpack.c.bf16 %v87_v5, %v86_v4  ;;  %v248_v9 = vld [vmem:[#allocation8 + $0x10] sm:$0xff]  ;;  %v249_v10 = vld [vmem:[#allocation8 + $0x18] sm:$0xff]  ;;  %v455_v11 = vpack.c.bf16 %v247_v8, %v246_v6  ;;  %v84_v12 = vld [vmem:[#allocation2] sm:$0xff]  ;;  %p581_p5 = scmp.lt.s32.totalorder %s366_s0, %s366_s0 }
  0x4d   :  { %407 = vmatmul.mubr.msk.f32.vlgmr.msra.gmra.mrb[0].mxu1 %vm89_vm1, %v85_v3  ;;  %451 = vmatprep.subr.bf16.mxu1 %v614_v1  ;;  %v458_v13 = vpack.c.bf16 %v249_v10, %v248_v9  ;;  %v250_v14 = vld [vmem:[#allocation8 + $0x20] sm:$0xff]  ;;  %v251_v15 = vld [vmem:[#allocation8 + $0x28] sm:$0xff]  ;;  %v252_v17 = vld [vmem:[#allocation8 + $0x30] sm:$0xff] }
  0x4e   :  { %413 = vmatprep.mubr.msk.f32.mxu1 %vm613_vm0, %v612_v0  ;;  %453 = vmatpush3.bf16.msra.mxu1 %v452_v7  ;;  %v461_v16 = vpack.c.bf16 %v251_v15, %v250_v14  ;;  %v253_v18 = vld [vmem:[#allocation8 + $0x38] sm:$0xff]  ;;  %v254_v20 = vld [vmem:[#allocation8 + $0x40] sm:$0xff]  ;;  %v255_v21 = vld [vmem:[#allocation8 + $0x48] sm:$0xff] }
  0x4f   :  { %456 = vmatpush3.bf16.msra.mxu0 %v455_v11  ;;  %v464_v19 = vpack.c.bf16 %v253_v18, %v252_v17  ;;  %v467_v22 = vpack.c.bf16 %v255_v21, %v254_v20  ;;  %v256_v23 = vld [vmem:[#allocation8 + $0x50] sm:$0xff]  ;;  %v257_v24 = vld [vmem:[#allocation8 + $0x58] sm:$0xff]  ;;  %v258_v26 = vld [vmem:[#allocation8 + $0x60] sm:$0xff] }
  0x50   :  { %457 = vmatprep.subr.bf16.mxu0 %v614_v1  ;;  %v470_v25 = vpack.c.bf16 %v257_v24, %v256_v23  ;;  %v259_v27 = vld [vmem:[#allocation8 + $0x68] sm:$0xff]  ;;  %v260_v29 = vld [vmem:[#allocation8 + $0x70] sm:$0xff]  ;;  %v261_v30 = vld [vmem:[#allocation8 + $0x78] sm:$0xff] }
  0x51   :  { %414 = vmatmul.mubr.msk.f32.vlgmr.msra.gmra.mrb[2].mxu1 %vm163_vm2, %v84_v12  ;;  %v473_v28 = vpack.c.bf16 %v259_v27, %v258_v26  ;;  %v476_v31 = vpack.c.bf16 %v261_v30, %v260_v29  ;;  %v378_v35 = vld [vmem:[%s748_s4] ss:$0 sm:$0xff] }
  0x52   :  { %v379_v40 = vld [vmem:[%s750_s6] ss:$0 sm:$0xff]  ;;  %s576_s6 = scalar_lea.vmem %s366_s0, 128 }
  0x53   :  { %459 = vmatpush3.bf16.msra.mxu0 %v458_v13  ;;  %v380_v44 = vld [vmem:[%s751_s7] ss:$0 sm:$0xff]  ;;  %p577_p4 = scmp.ne.s32.totalorder %s366_s0, %s576_s6  ;;  %p582_p6 = scmp.lt.s32.totalorder %s576_s6, %s576_s6 }
  0x54   :  { %460 = vmatprep.subr.bf16.mxu0 %v614_v1  ;;  %v381_v47 = vld [vmem:[%s752_s8] ss:$0 sm:$0xff] }
  0x55   :  { %p583_p7 = por %p582_p6, %p581_p5 }
  0x57   :  { %462 = vmatpush3.bf16.msra.mxu0 %v461_v16  ;;  %p584_p8 = pnand %p583_p7, %p577_p4 }
  0x58   :  { %463 = vmatprep.subr.bf16.mxu0 %v614_v1 }
  0x5b   :  { %465 = vmatpush3.bf16.msra.mxu0 %v464_v19 }
  0x5c   :  { %466 = vmatprep.subr.bf16.mxu0 %v614_v1 }
  0x5f   :  { %468 = vmatpush3.bf16.msra.mxu0 %v467_v22 }
  0x60   :  { %469 = vmatprep.subr.bf16.mxu0 %v614_v1 }
  0x63   :  { %471 = vmatpush3.bf16.msra.mxu0 %v470_v25 }
  0x64   :  { %472 = vmatprep.subr.bf16.mxu0 %v614_v1 }
  0x67   :  { %474 = vmatpush3.bf16.msra.mxu0 %v473_v28 }
  0x68   :  { %475 = vmatprep.subr.bf16.mxu0 %v614_v1 }
  0x6b   :  { %477 = vmatpush3.bf16.msra.mxu0 %v476_v31 }
 0x120   :  { %v159_v32 = vpop.f32.mrb[0].mxu1 }
 0x121   :  { %v408_v33 = vpop.f32.mrb[1].mxu1 }
 0x124   :  { %v233_v34 = vpop.f32.mrb[2].mxu1 }
 0x125   :  { %v234_v36 = vadd.f32 %v233_v34, %v159_v32  ;;  %v415_v37 = vpop.f32.mrb[3].mxu1 }
 0x127   :  { %v244_v38 = vadd.f32 %v378_v35, %v234_v36 }
 0x129   :  { %v245_v39 = vmax.f32 %v244_v38, 0.0 }
 0x12b   :  { %449 = vmatmul.mubr.f32.vlgmr.msra.gmra.mrb[0].mxu0 %v245_v39 }
 0x1fe   :  { %v335_v41 = vpop.f32.mrb[0].mxu0 }
 0x1ff   :  { %v336_v42 = vadd.f32 %v379_v40, %v335_v41  ;;  %v450_v43 = vpop.f32.mrb[1].mxu0 }
 0x201   :  { %v339_v45 = vmax.f32 %v336_v42, 0.0 }
 0x203   :  { %v347_v46 = vmul.f32 %v380_v44, %v339_v45 }
 0x205   :  { %348 = vadd.xlane.f32.xlu0 %v347_v46 }
 0x292   :  { %v349_v48 = vpop.xlane.xlu0 %348 }
 0x293   :  { %v357_v49 = vadd.f32 %v381_v47, %v349_v48 }
 0x295   :  { %358 = vst [vmem:[#allocation10] sm:$0xff] %v357_v49 }
 0x296   :  { %587 = shalt.err (!%p584_p8)
}
 0x297   :  { %s588_s22 = scalar_lea.hbm %s753_s9, 128 }
 0x298   :  { %p589_p9 = scmp.ne.s32.totalorder %s753_s9, %s588_s22  ;;  %p592_p10 = scmp.lt.u32.totalorder %s588_s22, %s753_s9 }
 0x29a   :  { %p594_p11 = pnand %p592_p10, %p589_p9 }
 0x29c   :  { %597 = shalt.err (!%p594_p11)
}
 0x29d   :  { %368 = dma.vmem_to_hbm [thread:$0]  %s366_s0, 128, %s753_s9, [#allocation4]  }
 0x29e   :  { %604 = dma.done.wait [#allocation4], 128  }
 0x29f   :  { %605 = vsyncadd [#allocation4], 4294967168 }
 0x2a0   :  { %372 = vsyncpa [#allocation3], 1 }
 0x2a1   :  { %373 = vsyncpa [#allocation6], 1 }
 0x2a2   :  { %374 = vsyncpa [#allocation9], 1 }
 0x2a3   :  { %375 = vsyncpa [#allocation4], 1 }

</bundles_post_ra>
